<compile_context>
chip_gen: v6e
topology: v6e:2x2x1
jax: 0.10.0
libtpu: 0.0.40
codegen_flags: <defaults>
</compile_context>

<pallas_src>
import math

import jax
import jax.numpy as jnp
from jax.experimental import pallas as pl
from jax.experimental.pallas import tpu as pltpu


def _pe_add_kernel(x_ref, pe_ref, o_ref):
    # x_ref : (TM, LW) VMEM tile
    # pe_ref: (1,  LW) VMEM tile (lane-dense tiled PE row); broadcasts natively.
    o_ref[...] = x_ref[...] + pe_ref[...]


def make_sinusoidal_table(max_len: int, input_dim: int) -> jnp.ndarray:
    """Build pe of shape (1, max_len, input_dim) exactly like the torch __init__."""
    position = jnp.arange(0, max_len, dtype=jnp.float32)[:, None]            # (L, 1)
    div_term = jnp.exp(
        jnp.arange(0, input_dim, 2, dtype=jnp.float32)
        * (-math.log(10000.0) / input_dim)
    )                                                                         # (D/2,)
    pe = jnp.zeros((max_len, input_dim), dtype=jnp.float32)
    pe = pe.at[:, 0::2].set(jnp.sin(position * div_term))
    pe = pe.at[:, 1::2].set(jnp.cos(position * div_term))
    return pe[None, :, :]                                                     # (1, L, D)


def _lane_dense_layout(total: int, d: int):
    """Pick (rows, lane_width) with lane_width a multiple of lcm(d, 128) that
    exactly divides `total` elements. Returns None if no such layout exists."""
    base = (d * 128) // math.gcd(d, 128)
    if total % base != 0:
        return None
    lw = base
    # Grow lane width (bigger unmasked stores) while it still divides the total.
    while lw * 2 <= 4096 and total % (lw * 2) == 0:
        lw *= 2
    return total // lw, lw


def position_encoding_forward(x: jnp.ndarray, pe: jnp.ndarray) -> jnp.ndarray:
    """x: (B, S, D); pe: (1, max_len, D). Returns (B, S, D)."""
    B, S, D = x.shape
    max_len = pe.shape[1]
    # Matches torch: self.pe[:, x.size(1), :] -> row index == seq_len.
    # Guard the inherited indexing quirk (row S must exist in the table).
    assert S < max_len, f"seq_len={S} indexes pe row S; requires S < max_len={max_len}"
    pe_row = pe[0, S, :].astype(x.dtype)                                      # (D,)

    total = B * S * D
    layout = _lane_dense_layout(total, D)

    if layout is not None:
        R, LW = layout
        x2 = x.reshape(R, LW)
        # Flattened (b, s, d) axis repeats the PE row with period D; LW % D == 0,
        # so every row of the (R, LW) slab sees the identical tiled pattern.
        pe_slab = jnp.tile(pe_row, LW // D).reshape(1, LW)
    else:
        # Fallback layout: D stays the lane axis (masked stores if D < 128),
        # but the row axis is still tiled/pipelined.
        R, LW = B * S, D
        x2 = x.reshape(R, LW)
        pe_slab = pe_row.reshape(1, LW)

    # ~4 MiB per block: double-buffered input + output blocks stay well under
    # v7x's 64 MiB physical VMEM while amortizing the ~0.35us per-step overhead.
    bytes_per_row = LW * x.dtype.itemsize
    tile_rows = min(R, max(8, (4 * 1024 * 1024) // bytes_per_row))
    if tile_rows < R:
        tile_rows = max(8, (tile_rows // 8) * 8)  # keep sublane-aligned blocks
    grid = (pl.cdiv(R, tile_rows),)

    block_bytes = tile_rows * LW * x.dtype.itemsize
    # in + out, each double-buffered, plus the resident PE slab and headroom.
    vmem_limit = min(max(4 * block_bytes + (2 << 20), 16 << 20), 48 << 20)

    out2 = pl.pallas_call(
        _pe_add_kernel,
        out_shape=jax.ShapeDtypeStruct((R, LW), x.dtype),
        grid_spec=pltpu.PrefetchScalarGridSpec(
            num_scalar_prefetch=0,
            grid=grid,
            in_specs=[
                pl.BlockSpec((tile_rows, LW), lambda i: (i, 0)),
                pl.BlockSpec((1, LW), lambda i: (0, 0)),
            ],
            out_specs=pl.BlockSpec((tile_rows, LW), lambda i: (i, 0)),
        ),
        compiler_params=pltpu.CompilerParams(
            dimension_semantics=("parallel",),
            vmem_limit_bytes=int(vmem_limit),
        ),
    )(x2, pe_slab)

    # TODO(synk): nn.Dropout(p=0.1) is identity in eval mode; training-mode dropout
    # (pltpu.prng_seed + prng_random_bits + mask/scale) would be fused right here.
    return out2.reshape(B, S, D)


if __name__ == "__main__":
    # Small shapes consistent with the module: (batch, seq_len, input_dim)
    B, S, D = 2, 8, 32
    max_len = 100

    key = jax.random.PRNGKey(0)
    x = jax.random.normal(key, (B, S, D), dtype=jnp.float32)

    pe = make_sinusoidal_table(max_len, D)

    y = position_encoding_forward(x, pe)
    y = jax.block_until_ready(y)

    # Reference in plain JAX (same math as the torch forward, eval-mode dropout).
    ref = x + pe[:, S, :][None, :, :]  # (1, D) -> broadcast over (B, S, D)
    assert y.shape == (B, S, D)
    assert jnp.allclose(y, ref, atol=1e-6, rtol=1e-6)

    print("KERNEL_OK")
</pallas_src>

<mosaic_0001>
module attributes {stable_mosaic.version = 11 : i64} {
  func.func @_pe_add_kernel(%arg0: i32, %arg1: memref<1x512xf32, #tpu.memory_space<vmem>>, %arg2: memref<1x512xf32, #tpu.memory_space<vmem>>, %arg3: memref<1x512xf32, #tpu.memory_space<vmem>>) attributes {dimension_semantics = [#tpu.dimension_semantics<parallel>], iteration_bounds = array<i64: 1>, scalar_prefetch = 0 : i64, scratch_operands = 0 : i64, tpu.core_type = #tpu.core_type<tc>, window_params = [{transform_indices = @transform_0, window_bounds = array<i64: 1, 512>}, {pipeline_mode = #tpu.pipeline_mode<synchronous>, transform_indices = @transform_1, window_bounds = array<i64: 1, 512>}, {transform_indices = @transform_2, window_bounds = array<i64: 1, 512>}]} {
    %c0 = arith.constant 0 : index
    %c0_0 = arith.constant 0 : index
    %0 = vector.load %arg1[%c0, %c0_0] : memref<1x512xf32, #tpu.memory_space<vmem>>, vector<1x512xf32>
    %c0_1 = arith.constant 0 : index
    %c0_2 = arith.constant 0 : index
    %1 = vector.load %arg2[%c0_1, %c0_2] : memref<1x512xf32, #tpu.memory_space<vmem>>, vector<1x512xf32>
    %2 = arith.addf %0, %1 : vector<1x512xf32>
    %c0_3 = arith.constant 0 : index
    %c0_4 = arith.constant 0 : index
    %3 = vector.load %arg3[%c0_3, %c0_4] : memref<1x512xf32, #tpu.memory_space<vmem>>, vector<1x512xf32>
    tpu.vector_store %arg3[%c0_3, %c0_4], %2 {strides = array<i32>} : memref<1x512xf32, #tpu.memory_space<vmem>>, vector<1x512xf32>,
    return
  }
  func.func @transform_0(%arg0: i32) -> (i32, i32) {
    %c0_i32 = arith.constant 0 : i32
    %c0_i32_0 = arith.constant 0 : i32
    return %arg0, %c0_i32 : i32, i32
  }
  func.func @transform_1(%arg0: i32) -> (i32, i32) {
    %c0_i32 = arith.constant 0 : i32
    %c0_i32_0 = arith.constant 0 : i32
    %c0_i32_1 = arith.constant 0 : i32
    return %c0_i32, %c0_i32_0 : i32, i32
  }
  func.func @transform_2(%arg0: i32) -> (i32, i32) {
    %c0_i32 = arith.constant 0 : i32
    %c0_i32_0 = arith.constant 0 : i32
    return %arg0, %c0_i32 : i32, i32
  }
}

</mosaic_0001>

<bundles_post_ra>
// kernel: tpu_custom_call.1
= control target key start
LH: loop header
LB: loop body
LE: loop exit
PB: predicated region body
PF: predicated region fallthrough
CT: control target
= control target key end

     0   :  { %7 = vsyncpa [#allocation3], 0  ;;  %s156_s0 = inlined_call_operand.hbm [shape: f32[1,512], index: 0, kind: input, shape index: {}]   ;;  %s157_s1 = inlined_call_operand.hbm [shape: f32[1,512], index: 1, kind: input, shape index: {}]   ;;  %s158_s2 = inlined_call_operand.hbm [shape: f32[1,512], index: 2, kind: output, shape index: {}]  }
   0x1   :  { %8 = vsyncpa [#allocation6], 0 }
   0x2   :  { %9 = vsyncpa [#allocation4], 0  ;;  %s129_s9 = smov [#allocation2]   ;;  %s130_s11 = smov [#allocation5]  }
   0x3   :  { %s16_s10 = sshll.u32 %s129_s9, 4  ;;  %s26_s12 = sshll.u32 %s130_s11, 4  ;;  %s17_s10 = int_to_ptr.vmem [resolvable:$true] %s16_s10  ;;  %s27_s12 = int_to_ptr.vmem [resolvable:$true] %s26_s12 }
   0x4   :  { %s71_s13 = scalar_lea.vmem %s17_s10, 64  ;;  %p76_p1 = scmp.lt.s32.totalorder %s17_s10, %s17_s10 }
   0x5   :  { %p72_p0 = scmp.ne.s32.totalorder %s17_s10, %s71_s13  ;;  %p77_p2 = scmp.lt.s32.totalorder %s71_s13, %s71_s13 }
   0x7   :  { %p78_p3 = por %p77_p2, %p76_p1 }
   0x9   :  { %p79_p4 = pnand %p78_p3, %p72_p0 }
   0xb   :  { %82 = shalt.err (!%p79_p4)
}
   0xc   :  { %19 = dma.hbm_to_vmem [thread:$0]  %s156_s0, 64, %s17_s10, [#allocation3]  }
   0xd   :  { %s91_s16 = scalar_lea.vmem %s27_s12, 64  ;;  %p96_p6 = scmp.lt.s32.totalorder %s27_s12, %s27_s12 }
   0xe   :  { %p92_p5 = scmp.ne.s32.totalorder %s27_s12, %s91_s16  ;;  %p97_p7 = scmp.lt.s32.totalorder %s91_s16, %s91_s16 }
  0x10   :  { %p98_p8 = por %p97_p7, %p96_p6 }
  0x12   :  { %p99_p9 = pnand %p98_p8, %p92_p5 }
  0x14   :  { %102 = shalt.err (!%p99_p9)
}
  0x15   :  { %29 = dma.hbm_to_vmem [thread:$0]  %s157_s1, 64, %s27_s12, [#allocation6]  }
  0x16   :  { %123 = dma.done.wait [#allocation3], 64  }
  0x17   :  { %124 = vsyncadd [#allocation3], 4294967232 }
  0x18   :  { %125 = dma.done.wait [#allocation6], 64  }
  0x19   :  { %126 = vsyncadd [#allocation6], 4294967232  ;;  %v39_v0 = vlaneseq  ;;  %s131_s19 = smov [#allocation7]   ;;  %v36_v1 = vld [vmem:[#allocation2] sm:$0xf] }
  0x1a   :  { %s50_s20 = sshll.u32 %s131_s19, 4  ;;  %v37_v2 = vld [vmem:[#allocation5] sm:$0xf]  ;;  %s51_s20 = int_to_ptr.vmem [resolvable:$true] %s50_s20 }
  0x1b   :  { %vm41_vm0 = vcmp.lt.s32.totalorder %v39_v0, 512  ;;  %v38_v3 = vadd.f32 %v37_v2, %v36_v1  ;;  %s103_s0 = scalar_lea.vmem %s51_s20, 64  ;;  %p108_p11 = scmp.lt.s32.totalorder %s51_s20, %s51_s20 }
  0x1c   :  { %p104_p10 = scmp.ne.s32.totalorder %s51_s20, %s103_s0  ;;  %p109_p12 = scmp.lt.s32.totalorder %s103_s0, %s103_s0 }
  0x1d   :  { %43 = vst.msk [vmem:[#allocation7] sm:$0xf] %vm41_vm0, %v38_v3 }
  0x1e   :  { %p110_p13 = por %p109_p12, %p108_p11 }
  0x20   :  { %p111_p0 = pnand %p110_p13, %p104_p10 }
  0x22   :  { %114 = shalt.err (!%p111_p0)
}
  0x23   :  { %53 = dma.vmem_to_hbm [thread:$0]  %s51_s20, 64, %s158_s2, [#allocation4]  }
  0x24   :  { %127 = dma.done.wait [#allocation4], 64  }
  0x25   :  { %128 = vsyncadd [#allocation4], 4294967232 }
  0x26   :  { %57 = vsyncpa [#allocation3], 1 }
  0x27   :  { %58 = vsyncpa [#allocation6], 1 }
  0x28   :  { %59 = vsyncpa [#allocation4], 1 }

</bundles_post_ra>
